<compile_context>
chip_gen: v7x
topology: tpu7x:2x2x1
jax: 0.10.0
libtpu: 0.0.40
codegen_flags: <defaults>
</compile_context>

<pallas_src>
import functools

import jax
import jax.numpy as jnp
from jax import lax
from jax.experimental import pallas as pl
from jax.experimental.pallas import tpu as pltpu


# ----------------------------- prologue kernel -------------------------------

def _project_kernel(x_ref, d_ref,
                    w_rgb_ref, b_rgb_ref,
                    w_lhs_ref, b_lhs_ref,
                    w_rhs_t_ref, b_rhs_row_ref,
                    lhs_ref, rhs_ref, xv_ref):
    """One pass over the flattened positions (grid over N tiles).

    x_ref / d_ref : (CP, TN) f32 channel-major input tiles
    w_*           : (CP, CP) f32, b_* : (CP, 1) / (1, CP) f32
    lhs_ref, xv_ref : (CP, TN) bf16 channel-major outputs
    rhs_ref         : (TN, CP) bf16 row-major output, so the attention logits
                      matmul is a plain (TK,CP)@(CP,TQ) without transposes.
    """
    d = d_ref[...]
    x = x_ref[...]

    lhs = jnp.dot(w_lhs_ref[...], d,
                  preferred_element_type=jnp.float32) + b_lhs_ref[...]
    xv = jnp.dot(w_rgb_ref[...], x,
                 preferred_element_type=jnp.float32) + b_rgb_ref[...]
    # rhs directly in (TN, CP): contract the channel dim of d with the channel
    # dim of w_rhs^T (same contraction pattern the previous kernel used).
    rhs = lax.dot_general(d, w_rhs_t_ref[...], (((0,), (0,)), ((), ())),
                          preferred_element_type=jnp.float32) + b_rhs_row_ref[...]

    lhs_ref[...] = lhs.astype(lhs_ref.dtype)
    xv_ref[...] = xv.astype(xv_ref.dtype)
    rhs_ref[...] = rhs.astype(rhs_ref.dtype)


# ---------------------------- attention kernel --------------------------------

def _attn_kernel(lhs_ref, rhs_ref, xv_ref, o_ref, m_s, acc_s, *, ones_row):
    """Grid = (query tiles [parallel], key tiles [arbitrary]).

    lhs_ref : (CP, TQ) bf16   rhs_ref : (TK, CP) bf16   xv_ref : (CP, TK) bf16
    o_ref   : (CP, TQ) f32    m_s : (1, TQ) f32         acc_s  : (CP, TQ) f32
    xv row `ones_row` is all ones, so acc row `ones_row` carries the softmax
    denominator (folded into the MXU value matmul).
    """
    ki = pl.program_id(1)
    nk = pl.num_programs(1)

    @pl.when(ki == 0)
    def _init():
        m_s[...] = jnp.full(m_s.shape, -jnp.inf, dtype=jnp.float32)
        acc_s[...] = jnp.zeros(acc_s.shape, dtype=jnp.float32)

    # logits[k, q] = sum_c rhs[k, c] * lhs[c, q]  -> (TK, TQ); bf16 MXU, f32 acc
    logits = jnp.dot(rhs_ref[...], lhs_ref[...],
                     preferred_element_type=jnp.float32)

    # Online (flash-style) softmax over the key axis; state is lane-dense (1,TQ)
    m_prev = m_s[...]
    m_new = jnp.maximum(m_prev, jnp.max(logits, axis=0, keepdims=True))
    alpha = jnp.exp(m_prev - m_new)                       # (1, TQ) f32
    p = jnp.exp(logits - m_new).astype(jnp.bfloat16)      # (TK, TQ) bf16

    # Large-K contraction: bf16 MXU operands, f32 accumulation.  Row `ones_row`
    # of xv is all ones -> acc row `ones_row` accumulates sum_k p[k, q].
    acc_s[...] = alpha * acc_s[...] + jnp.dot(
        xv_ref[...], p, preferred_element_type=jnp.float32)
    m_s[...] = m_new

    @pl.when(ki == nk - 1)
    def _finish():
        l = acc_s[ones_row:ones_row + 1, :]    # softmax denominator, (1, TQ)
        r = pl.reciprocal(l, approx=True)      # EUP slot
        r = r * (2.0 - l * r)                  # one Newton step -> ~f32 accuracy
        o_ref[...] = (acc_s[...] * r).astype(o_ref.dtype)


# --------------------------------- wrapper ------------------------------------

def _round_up(v, m):
    return ((v + m - 1) // m) * m


def depth_correlation_forward(x, depth_feature, params, *, tq=512, tk=512, tn=1024):
    """x, depth_feature: (B, C, H, W) float32 (NCHW, like PyTorch).
    params: (w_rgb, b_rgb, w_lhs, b_lhs, w_rhs, b_rhs), w (C, C), b (C, 1) —
    i.e. squeezed PyTorch Conv2d 1x1 weights/biases."""
    B, C, H, W = x.shape
    N = B * H * W
    w_rgb, b_rgb, w_lhs, b_lhs, w_rhs, b_rhs = params
    assert w_rgb.shape == (C, C), "PyTorch module requires planes == inplanes"

    # Channel pad: sublane density for small C plus one extra all-ones channel
    # used to fold the softmax denominator into the value matmul.
    CP = max(8, _round_up(C + 1, 8))
    ones_row = C

    tq = min(tq, N)
    tk = min(tk, N)
    tn = min(tn, N)
    # TODO(synk): no ragged-tile masking — N = B*H*W must divide evenly.
    assert N % tq == 0 and N % tk == 0 and N % tn == 0, "tiles must divide N"
    for t in (tq, tk, tn):
        assert t % 128 == 0 or t == N, "tiles must be multiples of 128 (or == N)"

    # ---- parameters: zero-pad to CP channels (f32; read once in prologue) ----
    def pad_w(w):
        return jnp.zeros((CP, CP), jnp.float32).at[:C, :C].set(w)

    def pad_b(b):
        return jnp.zeros((CP, 1), jnp.float32).at[:C, :].set(b)

    w_rgb_p = pad_w(w_rgb)
    w_lhs_p = pad_w(w_lhs)
    w_rhs_t = pad_w(w_rhs).T                      # (Cin, Cout) for row-major rhs
    b_lhs_p = pad_b(b_lhs)
    b_rgb_p = pad_b(b_rgb).at[ones_row, 0].set(1.0)   # all-ones denominator row
    b_rhs_r = pad_b(b_rhs).T                      # (1, CP)

    # ---- channel-major flatten (only swaps leading B and C axes) + zero-pad --
    x_cm = jnp.transpose(x, (1, 0, 2, 3)).reshape(C, N)
    d_cm = jnp.transpose(depth_feature, (1, 0, 2, 3)).reshape(C, N)
    x_cm = jnp.pad(x_cm, ((0, CP - C), (0, 0)))
    d_cm = jnp.pad(d_cm, ((0, CP - C), (0, 0)))

    # 48 MiB scoped VMEM: above v5e's 16 MiB default, safely under v7x's 64 MiB/TC.
    vmem_limit = 48 * 1024 * 1024

    # ---------------- pass 1: the three 1x1 projections (one pass) -----------
    cn_spec = pl.BlockSpec((CP, tn), lambda i: (0, i))
    w_spec = pl.BlockSpec((CP, CP), lambda i: (0, 0))
    bcol_spec = pl.BlockSpec((CP, 1), lambda i: (0, 0))
    brow_spec = pl.BlockSpec((1, CP), lambda i: (0, 0))
    rhs_out_spec = pl.BlockSpec((tn, CP), lambda i: (i, 0))

    lhs_cm, rhs_rm, xv_cm = pl.pallas_call(
        _project_kernel,
        out_shape=(jax.ShapeDtypeStruct((CP, N), jnp.bfloat16),   # lhs, channel-major
                   jax.ShapeDtypeStruct((N, CP), jnp.bfloat16),   # rhs, row-major
                   jax.ShapeDtypeStruct((CP, N), jnp.bfloat16)),  # xv,  channel-major
        grid_spec=pltpu.PrefetchScalarGridSpec(
            num_scalar_prefetch=0,
            grid=(N // tn,),
            in_specs=[cn_spec, cn_spec,
                      w_spec, bcol_spec,      # rgb encoder (+ ones row in bias)
                      w_spec, bcol_spec,      # lhs encoder
                      w_spec, brow_spec],     # rhs encoder (pre-transposed W)
            out_specs=[cn_spec, rhs_out_spec, cn_spec]),
        compiler_params=pltpu.CompilerParams(
            dimension_semantics=("parallel",),
            vmem_limit_bytes=vmem_limit),
    )(x_cm, d_cm, w_rgb_p, b_rgb_p, w_lhs_p, b_lhs_p, w_rhs_t, b_rhs_r)

    # ------------- pass 2: flash-style attention over all key tiles ----------
    lhs_spec = pl.BlockSpec((CP, tq), lambda qi, ki: (0, qi))
    rhs_spec = pl.BlockSpec((tk, CP), lambda qi, ki: (ki, 0))
    xv_spec = pl.BlockSpec((CP, tk), lambda qi, ki: (0, ki))
    out_spec = pl.BlockSpec((CP, tq), lambda qi, ki: (0, qi))

    y_cm = pl.pallas_call(
        functools.partial(_attn_kernel, ones_row=ones_row),
        out_shape=jax.ShapeDtypeStruct((CP, N), jnp.float32),
        grid_spec=pltpu.PrefetchScalarGridSpec(
            num_scalar_prefetch=0,
            grid=(N // tq, N // tk),
            in_specs=[lhs_spec, rhs_spec, xv_spec],
            out_specs=out_spec,
            scratch_shapes=[pltpu.VMEM((1, tq), jnp.float32),     # running max m
                            pltpu.VMEM((CP, tq), jnp.float32)]),  # acc (+denominator row)
        compiler_params=pltpu.CompilerParams(
            dimension_semantics=("parallel", "arbitrary"),
            vmem_limit_bytes=vmem_limit),
    )(lhs_cm, rhs_rm, xv_cm)

    y = y_cm[:C].reshape(C, B, H, W)
    return jnp.transpose(y, (1, 0, 2, 3)).astype(x.dtype)   # back to NCHW


# --------------------------- reference (plain JAX) ----------------------------

def _ref_forward(x, depth_feature, params):
    B, C, H, W = x.shape
    N = B * H * W
    w_rgb, b_rgb, w_lhs, b_lhs, w_rhs, b_rhs = params
    x_flat = jnp.transpose(x, (0, 2, 3, 1)).reshape(N, C)
    d_flat = jnp.transpose(depth_feature, (0, 2, 3, 1)).reshape(N, C)
    xv = x_flat @ w_rgb.T + b_rgb.T
    lhs = d_flat @ w_lhs.T + b_lhs.T
    rhs = d_flat @ w_rhs.T + b_rhs.T
    logits = lhs @ rhs.T
    w = jax.nn.softmax(logits, axis=1)
    y = (w @ xv).reshape(B, H, W, C)
    return jnp.transpose(y, (0, 3, 1, 2))


# --------------------------------- main ---------------------------------------

if __name__ == "__main__":
    B, C, H, W = 2, 4, 16, 16        # inplanes = planes = C (required by module)
    key = jax.random.PRNGKey(0)
    kx, kd, k0, k1, k2, k3, k4, k5 = jax.random.split(key, 8)

    x = jax.random.normal(kx, (B, C, H, W), dtype=jnp.float32)
    depth = jax.random.normal(kd, (B, C, H, W), dtype=jnp.float32)

    scale = 1.0 / jnp.sqrt(jnp.float32(C))
    w_rgb = jax.random.normal(k0, (C, C), dtype=jnp.float32) * scale
    b_rgb = jax.random.normal(k1, (C, 1), dtype=jnp.float32) * scale
    w_lhs = jax.random.normal(k2, (C, C), dtype=jnp.float32) * scale
    b_lhs = jax.random.normal(k3, (C, 1), dtype=jnp.float32) * scale
    w_rhs = jax.random.normal(k4, (C, C), dtype=jnp.float32) * scale
    b_rhs = jax.random.normal(k5, (C, 1), dtype=jnp.float32) * scale
    params = (w_rgb, b_rgb, w_lhs, b_lhs, w_rhs, b_rhs)

    # Small tiles so the self-test exercises a multi-tile grid (4 query x 4 key
    # tiles) and the online-softmax carry; production defaults are 512.
    fwd = jax.jit(functools.partial(depth_correlation_forward,
                                    tq=128, tk=128, tn=256))
    y = fwd(x, depth, params)
    y = jax.block_until_ready(y)

    y_ref = _ref_forward(x, depth, params)
    assert y.shape == (B, C, H, W)
    # bf16 attention streams / MXU operands + approx reciprocal(+Newton) =>
    # relaxed tolerance vs the f32 reference (structural bugs would be O(1) off).
    assert jnp.allclose(y, y_ref, rtol=5e-2, atol=5e-2), "mismatch vs JAX reference"

    print("KERNEL_OK")
</pallas_src>

<mosaic_0001>
module attributes {stable_mosaic.version = 11 : i64} {
  func.func @_attn_kernel(%arg0: i32, %arg1: i32, %arg2: memref<8x128xbf16, #tpu.memory_space<vmem>>, %arg3: memref<128x8xbf16, #tpu.memory_space<vmem>>, %arg4: memref<8x128xbf16, #tpu.memory_space<vmem>>, %arg5: memref<8x128xf32, #tpu.memory_space<vmem>>, %arg6: memref<1x128xf32, #tpu.memory_space<vmem>>, %arg7: memref<8x128xf32, #tpu.memory_space<vmem>>) attributes {dimension_semantics = [#tpu.dimension_semantics<parallel>, #tpu.dimension_semantics<arbitrary>], iteration_bounds = array<i64: 4, 4>, scalar_prefetch = 0 : i64, scratch_operands = 2 : i64, tpu.core_type = #tpu.core_type<tc>, window_params = [{transform_indices = @transform_0, window_bounds = array<i64: 8, 128>}, {transform_indices = @transform_1, window_bounds = array<i64: 128, 8>}, {transform_indices = @transform_2, window_bounds = array<i64: 8, 128>}, {transform_indices = @transform_3, window_bounds = array<i64: 8, 128>}]} {
    %c0_i32 = arith.constant 0 : i32
    %0 = arith.cmpi eq, %arg1, %c0_i32 : i32
    %1 = arith.extui %0 : i1 to i32
    %c0_i32_0 = arith.constant 0 : i32
    %2 = arith.cmpi ne, %1, %c0_i32_0 : i32
    scf.if %2 {
      %cst_17 = arith.constant 0xFF800000 : f32
      %27 = vector.broadcast %cst_17 : f32 to vector<1x128xf32>
      %c0_18 = arith.constant 0 : index
      %c0_19 = arith.constant 0 : index
      %28 = vector.load %arg6[%c0_18, %c0_19] : memref<1x128xf32, #tpu.memory_space<vmem>>, vector<1x128xf32>
      tpu.vector_store %arg6[%c0_18, %c0_19], %27 {strides = array<i32>} : memref<1x128xf32, #tpu.memory_space<vmem>>, vector<1x128xf32>,
      %cst_20 = arith.constant 0.000000e+00 : f32
      %29 = vector.broadcast %cst_20 : f32 to vector<8x128xf32>
      %c0_21 = arith.constant 0 : index
      %c0_22 = arith.constant 0 : index
      %30 = vector.load %arg7[%c0_21, %c0_22] : memref<8x128xf32, #tpu.memory_space<vmem>>, vector<8x128xf32>
      tpu.vector_store %arg7[%c0_21, %c0_22], %29 {strides = array<i32>} : memref<8x128xf32, #tpu.memory_space<vmem>>, vector<8x128xf32>,
    } else {
    }
    %c0 = arith.constant 0 : index
    %c0_1 = arith.constant 0 : index
    %3 = vector.load %arg3[%c0, %c0_1] : memref<128x8xbf16, #tpu.memory_space<vmem>>, vector<128x8xbf16>
    %c0_2 = arith.constant 0 : index
    %c0_3 = arith.constant 0 : index
    %4 = vector.load %arg2[%c0_2, %c0_3] : memref<8x128xbf16, #tpu.memory_space<vmem>>, vector<8x128xbf16>
    %cst = arith.constant dense<0.000000e+00> : vector<128x128xf32>
    %5 = tpu.matmul %3, %4, %cst {dimension_numbers = #tpu.dot_dimension_numbers<[1], [0], [0], [1], [0, 0, 1, 1], [], []>} : vector<128x8xbf16>, vector<8x128xbf16>, vector<128x128xf32> -> vector<128x128xf32>
    %c0_4 = arith.constant 0 : index
    %c0_5 = arith.constant 0 : index
    %6 = vector.load %arg6[%c0_4, %c0_5] : memref<1x128xf32, #tpu.memory_space<vmem>>, vector<1x128xf32>
    %cst_6 = arith.constant dense<0xFF800000> : vector<128xf32>
    %7 = vector.multi_reduction <maximumf>, %5, %cst_6 [0] : vector<128x128xf32> to vector<128xf32>
    %8 = vector.shape_cast %7 : vector<128xf32> to vector<1x128xf32>
    %9 = arith.maximumf %6, %8 : vector<1x128xf32>
    %10 = arith.subf %6, %9 : vector<1x128xf32>
    %11 = math.exp %10 : vector<1x128xf32>
    %12 = vector.broadcast %9 : vector<1x128xf32> to vector<128x128xf32>
    %13 = arith.subf %5, %12 : vector<128x128xf32>
    %14 = math.exp %13 : vector<128x128xf32>
    %15 = arith.truncf %14 : vector<128x128xf32> to vector<128x128xbf16>
    %c0_7 = arith.constant 0 : index
    %c0_8 = arith.constant 0 : index
    %16 = vector.load %arg7[%c0_7, %c0_8] : memref<8x128xf32, #tpu.memory_space<vmem>>, vector<8x128xf32>
    %17 = vector.broadcast %11 : vector<1x128xf32> to vector<8x128xf32>
    %18 = arith.mulf %17, %16 : vector<8x128xf32>
    %c0_9 = arith.constant 0 : index
    %c0_10 = arith.constant 0 : index
    %19 = vector.load %arg4[%c0_9, %c0_10] : memref<8x128xbf16, #tpu.memory_space<vmem>>, vector<8x128xbf16>
    %cst_11 = arith.constant dense<0.000000e+00> : vector<8x128xf32>
    %20 = tpu.matmul %19, %15, %cst_11 {dimension_numbers = #tpu.dot_dimension_numbers<[1], [0], [0], [1], [0, 0, 1, 1], [], []>} : vector<8x128xbf16>, vector<128x128xbf16>, vector<8x128xf32> -> vector<8x128xf32>
    %21 = arith.addf %18, %20 : vector<8x128xf32>
    %c0_12 = arith.constant 0 : index
    %c0_13 = arith.constant 0 : index
    %22 = vector.load %arg7[%c0_12, %c0_13] : memref<8x128xf32, #tpu.memory_space<vmem>>, vector<8x128xf32>
    tpu.vector_store %arg7[%c0_12, %c0_13], %21 {strides = array<i32>} : memref<8x128xf32, #tpu.memory_space<vmem>>, vector<8x128xf32>,
    %c0_14 = arith.constant 0 : index
    %c0_15 = arith.constant 0 : index
    %23 = vector.load %arg6[%c0_14, %c0_15] : memref<1x128xf32, #tpu.memory_space<vmem>>, vector<1x128xf32>
    tpu.vector_store %arg6[%c0_14, %c0_15], %9 {strides = array<i32>} : memref<1x128xf32, #tpu.memory_space<vmem>>, vector<1x128xf32>,
    %c3_i32 = arith.constant 3 : i32
    %24 = arith.cmpi eq, %arg1, %c3_i32 : i32
    %25 = arith.extui %24 : i1 to i32
    %c0_i32_16 = arith.constant 0 : i32
    %26 = arith.cmpi ne, %25, %c0_i32_16 : i32
    scf.if %26 {
      %c4 = arith.constant 4 : index
      %c0_17 = arith.constant 0 : index
      %27 = vector.load %arg7[%c4, %c0_17] : memref<8x128xf32, #tpu.memory_space<vmem>>, vector<1x128xf32>
      %28 = tpu.reciprocal %27 {approx = true} : vector<1x128xf32> -> vector<1x128xf32>
      %29 = arith.mulf %27, %28 : vector<1x128xf32>
      %cst_18 = arith.constant 2.000000e+00 : f32
      %30 = vector.broadcast %cst_18 : f32 to vector<1x128xf32>
      %31 = arith.subf %30, %29 : vector<1x128xf32>
      %32 = arith.mulf %28, %31 : vector<1x128xf32>
      %c0_19 = arith.constant 0 : index
      %c0_20 = arith.constant 0 : index
      %33 = vector.load %arg7[%c0_19, %c0_20] : memref<8x128xf32, #tpu.memory_space<vmem>>, vector<8x128xf32>
      %34 = vector.broadcast %32 : vector<1x128xf32> to vector<8x128xf32>
      %35 = arith.mulf %33, %34 : vector<8x128xf32>
      %c0_21 = arith.constant 0 : index
      %c0_22 = arith.constant 0 : index
      %36 = vector.load %arg5[%c0_21, %c0_22] : memref<8x128xf32, #tpu.memory_space<vmem>>, vector<8x128xf32>
      tpu.vector_store %arg5[%c0_21, %c0_22], %35 {strides = array<i32>} : memref<8x128xf32, #tpu.memory_space<vmem>>, vector<8x128xf32>,
    } else {
    }
    return
  }
  func.func @transform_0(%arg0: i32, %arg1: i32) -> (i32, i32) {
    %c0_i32 = arith.constant 0 : i32
    %c0_i32_0 = arith.constant 0 : i32
    return %c0_i32, %arg0 : i32, i32
  }
  func.func @transform_1(%arg0: i32, %arg1: i32) -> (i32, i32) {
    %c0_i32 = arith.constant 0 : i32
    %c0_i32_0 = arith.constant 0 : i32
    return %arg1, %c0_i32 : i32, i32
  }
  func.func @transform_2(%arg0: i32, %arg1: i32) -> (i32, i32) {
    %c0_i32 = arith.constant 0 : i32
    %c0_i32_0 = arith.constant 0 : i32
    return %c0_i32, %arg1 : i32, i32
  }
  func.func @transform_3(%arg0: i32, %arg1: i32) -> (i32, i32) {
    %c0_i32 = arith.constant 0 : i32
    %c0_i32_0 = arith.constant 0 : i32
    return %c0_i32, %arg0 : i32, i32
  }
}

module attributes {stable_mosaic.version = 11 : i64} {
  func.func @_project_kernel(%arg0: i32, %arg1: memref<8x256xf32, #tpu.memory_space<vmem>>, %arg2: memref<8x256xf32, #tpu.memory_space<vmem>>, %arg3: memref<8x8xf32, #tpu.memory_space<vmem>>, %arg4: memref<8x1xf32, #tpu.memory_space<vmem>>, %arg5: memref<8x8xf32, #tpu.memory_space<vmem>>, %arg6: memref<8x1xf32, #tpu.memory_space<vmem>>, %arg7: memref<8x8xf32, #tpu.memory_space<vmem>>, %arg8: memref<1x8xf32, #tpu.memory_space<vmem>>, %arg9: memref<8x256xbf16, #tpu.memory_space<vmem>>, %arg10: memref<256x8xbf16, #tpu.memory_space<vmem>>, %arg11: memref<8x256xbf16, #tpu.memory_space<vmem>>) attributes {dimension_semantics = [#tpu.dimension_semantics<parallel>], iteration_bounds = array<i64: 2>, scalar_prefetch = 0 : i64, scratch_operands = 0 : i64, tpu.core_type = #tpu.core_type<tc>, window_params = [{transform_indices = @transform_0, window_bounds = array<i64: 8, 256>}, {transform_indices = @transform_1, window_bounds = array<i64: 8, 256>}, {pipeline_mode = #tpu.pipeline_mode<synchronous>, transform_indices = @transform_2, window_bounds = array<i64: 8, 8>}, {pipeline_mode = #tpu.pipeline_mode<synchronous>, transform_indices = @transform_3, window_bounds = array<i64: 8, 1>}, {pipeline_mode = #tpu.pipeline_mode<synchronous>, transform_indices = @transform_4, window_bounds = array<i64: 8, 8>}, {pipeline_mode = #tpu.pipeline_mode<synchronous>, transform_indices = @transform_5, window_bounds = array<i64: 8, 1>}, {pipeline_mode = #tpu.pipeline_mode<synchronous>, transform_indices = @transform_6, window_bounds = array<i64: 8, 8>}, {pipeline_mode = #tpu.pipeline_mode<synchronous>, transform_indices = @transform_7, window_bounds = array<i64: 1, 8>}, {transform_indices = @transform_8, window_bounds = array<i64: 8, 256>}, {transform_indices = @transform_9, window_bounds = array<i64: 256, 8>}, {transform_indices = @transform_10, window_bounds = array<i64: 8, 256>}]} {
    %c0 = arith.constant 0 : index
    %c0_0 = arith.constant 0 : index
    %0 = vector.load %arg2[%c0, %c0_0] : memref<8x256xf32, #tpu.memory_space<vmem>>, vector<8x256xf32>
    %c0_1 = arith.constant 0 : index
    %c0_2 = arith.constant 0 : index
    %1 = vector.load %arg1[%c0_1, %c0_2] : memref<8x256xf32, #tpu.memory_space<vmem>>, vector<8x256xf32>
    %c0_3 = arith.constant 0 : index
    %c0_4 = arith.constant 0 : index
    %2 = vector.load %arg5[%c0_3, %c0_4] : memref<8x8xf32, #tpu.memory_space<vmem>>, vector<8x8xf32>
    %cst = arith.constant dense<0.000000e+00> : vector<8x256xf32>
    %3 = tpu.matmul %2, %0, %cst {dimension_numbers = #tpu.dot_dimension_numbers<[1], [0], [0], [1], [0, 0, 1, 1], [], []>} : vector<8x8xf32>, vector<8x256xf32>, vector<8x256xf32> -> vector<8x256xf32>
    %c0_5 = arith.constant 0 : index
    %c0_6 = arith.constant 0 : index
    %4 = vector.load %arg6[%c0_5, %c0_6] : memref<8x1xf32, #tpu.memory_space<vmem>>, vector<8x1xf32>
    %5 = vector.broadcast %4 : vector<8x1xf32> to vector<8x256xf32>
    %6 = arith.addf %3, %5 : vector<8x256xf32>
    %c0_7 = arith.constant 0 : index
    %c0_8 = arith.constant 0 : index
    %7 = vector.load %arg3[%c0_7, %c0_8] : memref<8x8xf32, #tpu.memory_space<vmem>>, vector<8x8xf32>
    %cst_9 = arith.constant dense<0.000000e+00> : vector<8x256xf32>
    %8 = tpu.matmul %7, %1, %cst_9 {dimension_numbers = #tpu.dot_dimension_numbers<[1], [0], [0], [1], [0, 0, 1, 1], [], []>} : vector<8x8xf32>, vector<8x256xf32>, vector<8x256xf32> -> vector<8x256xf32>
    %c0_10 = arith.constant 0 : index
    %c0_11 = arith.constant 0 : index
    %9 = vector.load %arg4[%c0_10, %c0_11] : memref<8x1xf32, #tpu.memory_space<vmem>>, vector<8x1xf32>
    %10 = vector.broadcast %9 : vector<8x1xf32> to vector<8x256xf32>
    %11 = arith.addf %8, %10 : vector<8x256xf32>
    %c0_12 = arith.constant 0 : index
    %c0_13 = arith.constant 0 : index
    %12 = vector.load %arg7[%c0_12, %c0_13] : memref<8x8xf32, #tpu.memory_space<vmem>>, vector<8x8xf32>
    %cst_14 = arith.constant dense<0.000000e+00> : vector<256x8xf32>
    %13 = tpu.matmul %0, %12, %cst_14 {dimension_numbers = #tpu.dot_dimension_numbers<[0], [0], [1], [1], [0, 1, 1, 1], [], []>} : vector<8x256xf32>, vector<8x8xf32>, vector<256x8xf32> -> vector<256x8xf32>
    %c0_15 = arith.constant 0 : index
    %c0_16 = arith.constant 0 : index
    %14 = vector.load %arg8[%c0_15, %c0_16] : memref<1x8xf32, #tpu.memory_space<vmem>>, vector<1x8xf32>
    %15 = vector.broadcast %14 : vector<1x8xf32> to vector<256x8xf32>
    %16 = arith.addf %13, %15 : vector<256x8xf32>
    %17 = arith.truncf %6 : vector<8x256xf32> to vector<8x256xbf16>
    %c0_17 = arith.constant 0 : index
    %c0_18 = arith.constant 0 : index
    %18 = vector.load %arg9[%c0_17, %c0_18] : memref<8x256xbf16, #tpu.memory_space<vmem>>, vector<8x256xbf16>
    tpu.vector_store %arg9[%c0_17, %c0_18], %17 {strides = array<i32>} : memref<8x256xbf16, #tpu.memory_space<vmem>>, vector<8x256xbf16>,
    %19 = arith.truncf %11 : vector<8x256xf32> to vector<8x256xbf16>
    %c0_19 = arith.constant 0 : index
    %c0_20 = arith.constant 0 : index
    %20 = vector.load %arg11[%c0_19, %c0_20] : memref<8x256xbf16, #tpu.memory_space<vmem>>, vector<8x256xbf16>
    tpu.vector_store %arg11[%c0_19, %c0_20], %19 {strides = array<i32>} : memref<8x256xbf16, #tpu.memory_space<vmem>>, vector<8x256xbf16>,
    %21 = arith.truncf %16 : vector<256x8xf32> to vector<256x8xbf16>
    %c0_21 = arith.constant 0 : index
    %c0_22 = arith.constant 0 : index
    %22 = vector.load %arg10[%c0_21, %c0_22] : memref<256x8xbf16, #tpu.memory_space<vmem>>, vector<256x8xbf16>
    tpu.vector_store %arg10[%c0_21, %c0_22], %21 {strides = array<i32>} : memref<256x8xbf16, #tpu.memory_space<vmem>>, vector<256x8xbf16>,
    return
  }
  func.func @transform_0(%arg0: i32) -> (i32, i32) {
    %c0_i32 = arith.constant 0 : i32
    %c0_i32_0 = arith.constant 0 : i32
    return %c0_i32, %arg0 : i32, i32
  }
  func.func @transform_1(%arg0: i32) -> (i32, i32) {
    %c0_i32 = arith.constant 0 : i32
    %c0_i32_0 = arith.constant 0 : i32
    return %c0_i32, %arg0 : i32, i32
  }
  func.func @transform_2(%arg0: i32) -> (i32, i32) {
    %c0_i32 = arith.constant 0 : i32
    %c0_i32_0 = arith.constant 0 : i32
    %c0_i32_1 = arith.constant 0 : i32
    return %c0_i32, %c0_i32_0 : i32, i32
  }
  func.func @transform_3(%arg0: i32) -> (i32, i32) {
    %c0_i32 = arith.constant 0 : i32
    %c0_i32_0 = arith.constant 0 : i32
    %c0_i32_1 = arith.constant 0 : i32
    return %c0_i32, %c0_i32_0 : i32, i32
  }
  func.func @transform_4(%arg0: i32) -> (i32, i32) {
    %c0_i32 = arith.constant 0 : i32
    %c0_i32_0 = arith.constant 0 : i32
    %c0_i32_1 = arith.constant 0 : i32
    return %c0_i32, %c0_i32_0 : i32, i32
  }
  func.func @transform_5(%arg0: i32) -> (i32, i32) {
    %c0_i32 = arith.constant 0 : i32
    %c0_i32_0 = arith.constant 0 : i32
    %c0_i32_1 = arith.constant 0 : i32
    return %c0_i32, %c0_i32_0 : i32, i32
  }
  func.func @transform_6(%arg0: i32) -> (i32, i32) {
    %c0_i32 = arith.constant 0 : i32
    %c0_i32_0 = arith.constant 0 : i32
    %c0_i32_1 = arith.constant 0 : i32
    return %c0_i32, %c0_i32_0 : i32, i32
  }
  func.func @transform_7(%arg0: i32) -> (i32, i32) {
    %c0_i32 = arith.constant 0 : i32
    %c0_i32_0 = arith.constant 0 : i32
    %c0_i32_1 = arith.constant 0 : i32
    return %c0_i32, %c0_i32_0 : i32, i32
  }
  func.func @transform_8(%arg0: i32) -> (i32, i32) {
    %c0_i32 = arith.constant 0 : i32
    %c0_i32_0 = arith.constant 0 : i32
    return %c0_i32, %arg0 : i32, i32
  }
  func.func @transform_9(%arg0: i32) -> (i32, i32) {
    %c0_i32 = arith.constant 0 : i32
    %c0_i32_0 = arith.constant 0 : i32
    return %arg0, %c0_i32 : i32, i32
  }
  func.func @transform_10(%arg0: i32) -> (i32, i32) {
    %c0_i32 = arith.constant 0 : i32
    %c0_i32_0 = arith.constant 0 : i32
    return %c0_i32, %arg0 : i32, i32
  }
}

</mosaic_0001>

<bundles_post_ra>
// kernel: depth_correlation_forward.3
= control target key start
LH: loop header
LB: loop body
LE: loop exit
PB: predicated region body
PF: predicated region fallthrough
CT: control target
= control target key end

     0   :  { %s890_s12 = smov 0   ;;  %s892_s13 = smov 0   ;;  %s1016_s0 = inlined_call_operand.vmem [shape: bf16[8,512], index: 0, kind: input, shape index: {}]   ;;  %s1017_s1 = inlined_call_operand.vmem [shape: bf16[512,8], index: 1, kind: input, shape index: {}]   ;;  %s1018_s2 = inlined_call_operand.vmem [shape: bf16[8,512], index: 2, kind: input, shape index: {}]   ;;  %s1019_s3 = inlined_call_operand.vmem [shape: f32[8,512], index: 3, kind: output, shape index: {}]  }
   0x1   :  { %s894_s14 = smov 0   ;;  %s896_s15 = smov 0  }
   0x2   :  { %s898_s16 = smov 0  }
   0x3 LB: > { %s22_s17 = sadd.s32 1, %s856_s14  ;;  %s25_s18 = sadd.s32 1, %s860_s15  ;;  %s864_s16 = sphi %s898_s16, %s13_s16   ;;  %s860_s15 = sphi %s896_s15, %s1023_s15   ;;  %s856_s14 = sphi %s894_s14, %s1022_s14   ;;  %s852_s13 = sphi %s892_s13, %s1021_s13   ;;  %s848_s12 = sphi %s890_s12, %s1020_s12  }
   0x4   : > { %p23_p0 = scmp.ge.s32.totalorder %s22_s17, 4  ;;  %p655_p1 = scmp.ge.s32.totalorder %s864_s16, 1 }
   0x5   : > { %p168_p2 = scmp.lt.s32.totalorder %s864_s16, 17 }
   0x6   : > { %s1025_s17 = smov (%p23_p0, %s22_s17), 0  ;;  %s1027_s18 = smov (!%p23_p0, %s25_s18), %s860_s15 }
   0x7   : > { %p169_p3 = pnand %p655_p1, %p168_p2  ;;  %p27_p4 = scmp.ge.s32.totalorder %s1027_s18, 4 }
   0x8   : > { %p199_p5 = scmp.lt.s32.totalorder (!%p169_p3), %s852_s13, 3  ;;  %s657_s19 = sshll.u32 (!%p169_p3), %s848_s12, 4 }
   0x9   : > { %s1029_s18 = smov (%p27_p4, %s1027_s18), 0  ;;  %172 = sbr.rel (%p169_p3) target bundleno = 588 (0x24c), region = 32 }
   0xa   : > { %p204_p6 = scmp.lt.s32.totalorder (!%p169_p3), %s657_s19, 63  ;;  %p209_p7 = scmp.lt.s32.totalorder (!%p169_p3), %s848_s12, 3 }
   0xb   : > { %p661_p8 = scmp.ne.s32.totalorder (!%p169_p3), %s848_s12, 0 }
  0x10   : > { %s1031_s13 = smov (!%p199_p5, %s852_s13), 3  ;;  %s1033_s19 = smov (!%p204_p6, %s657_s19), 63 }
  0x11   : > { %s656_s20 = sshll.u32 %s1031_s13, 2  ;;  %s660_s21 = sshll.u32 %s1031_s13, 3  ;;  %v866_v0 = vmov (!%p661_p8), -inf   ;;  %v867_v1 = vmov (!%p661_p8), 0.0  }
  0x12   : > { %s202_s24 = scalar_lea.vmem %s1016_s0, %s656_s20  ;;  %s658_s25 = sshll.u32 %s1033_s19, 2  ;;  %222 = vst [vmem:[#allocation2] sm:$0x1] (!%p661_p8), %v866_v0  ;;  %223 = vst [vmem:[#allocation3] sm:$0xff] (!%p661_p8), %v867_v1 }
  0x13   : > { %s930_s28 = scalar_lea.vmem %s1017_s1, %s658_s25  ;;  %s935_s4 = scalar_lea.vmem %s1019_s3, %s660_s21 }
  0x14   : > { %s210_s5 = scalar_select %p209_p7, %s848_s12, 3 }
  0x15   : > { %221 = sbr.rel (%p661_p8) target bundleno = 28 (0x1c), region = 36 }
  0x16   : > { %s659_s6 = sshll.u32 %s210_s5, 2 }
  0x17   : > { %s941_s9 = scalar_lea.vmem %s1018_s2, %s659_s6 }
  0x1c PF: > { %v240_v2 = vld [vmem:[%s202_s24] sm:$0xf]  ;;  %vm306_vm0 = vcmask 1043456   ;;  %vm281_vm1 = vcmask 64512   ;;  %v783_v5 = vld [vmem:[%s930_s28 + $0x8] sm:$0xff]   ;;  %v784_v6 = vld [vmem:[%s930_s28 + $0x10] sm:$0xff]   ;;  %v434_v46 = vlaneseq }
  0x1d   : > { %v782_v3 = vld [vmem:[%s930_s28] sm:$0xff]   ;;  %737 = vmatprep.subr.msk.bf16.mxu0 %vm306_vm0, %v240_v2  ;;  %v308_v4 = vsel %vm306_vm0, %v240_v2, 0  ;;  %v785_v7 = vld [vmem:[%s930_s28 + $0x18] sm:$0xff]   ;;  %v787_v9 = vld [vmem:[%s930_s28 + $0x28] sm:$0xff]   ;;  %v868_v12 = vmov 0.0   ;;  %vm869_vm2 = vmmov 0  }
  0x1e   : > { %700 = vmatpush3.bf16.msra.mxu0 %v308_v4  ;;  %701 = vmatprep.mubr.msk.bf16.mxu0 %vm281_vm1, %v782_v3  ;;  %v786_v8 = vld [vmem:[%s930_s28 + $0x20] sm:$0xff]   ;;  %v788_v10 = vld [vmem:[%s930_s28 + $0x30] sm:$0xff]   ;;  %v789_v11 = vld [vmem:[%s930_s28 + $0x38] sm:$0xff]   ;;  %v435_v49 = vshrl.u32 %v434_v46, 7  ;;  %p678_p9 = scmp.ne.s32.totalorder %s848_s12, 3 }
  0x1f   : > { %717 = vmatprep.subr.bf16.mxu1 %v868_v12  ;;  %733 = vmatprep.mubr.msk.bf16.mxu1 %vm869_vm2, %v868_v12  ;;  %v407_v51 = vld [vmem:[#allocation2] sm:$0x1] }
  0x20   : > { %v980_v53 = vsub.s32 0, %v435_v49 }
  0x21   : > { %702 = vmatmul.mubr.msk.bf16.vlgmr.msra.gmra.mrb[0].mxu0 %vm281_vm1, %v783_v5 }
  0x22   : > { %705 = vmatprep.mubr.msk.bf16.mxu0 %vm281_vm1, %v784_v6 }
  0x29   : > { %706 = vmatmul.mubr.msk.bf16.gmra.mrb[4].mxu0 %vm281_vm1, %v785_v7 }
  0x2a   : > { %709 = vmatprep.mubr.msk.bf16.mxu0 %vm281_vm1, %v786_v8 }
  0x31   : > { %710 = vmatmul.mubr.msk.bf16.gmra.mrb[8].mxu0 %vm281_vm1, %v787_v9 }
  0x32   : > { %713 = vmatprep.mubr.msk.bf16.mxu0 %vm281_vm1, %v788_v10 }
  0x39   : > { %714 = vmatmul.mubr.msk.bf16.gmra.mrb[12].mxu0 %vm281_vm1, %v789_v11 }
  0xf4   : > { %v703_v13 = vpop.f32.mrb[0].mxu0 }
  0xf5   : > { %v344_v14 = vpop.f32.mrb[1].mxu0 }
  0xf6   : > { %v704_v15 = vpop.f32.mrb[2].mxu0 }
  0xf7   : > { %v347_v16 = vpop.f32.mrb[3].mxu0 }
  0xfc   : > { %v962_v17 = vpop.f32.mrb[4].mxu0 }
  0xfd   : > { %v410_v18 = vmax.f32 %v703_v13, %v962_v17  ;;  %v360_v19 = vpop.f32.mrb[5].mxu0 }
  0xfe   : > { %v408_v20 = vmax.f32 %v344_v14, %v360_v19  ;;  %v965_v21 = vpop.f32.mrb[6].mxu0 }
  0xff   : > { %v411_v22 = vmax.f32 %v704_v15, %v965_v21  ;;  %v363_v23 = vpop.f32.mrb[7].mxu0 }
 0x100   : > { %v409_v24 = vmax.f32 %v347_v16, %v363_v23 }
 0x104   : > { %v968_v25 = vpop.f32.mrb[8].mxu0 }
 0x105   : > { %v414_v26 = vmax.f32 %v410_v18, %v968_v25  ;;  %v376_v27 = vpop.f32.mrb[9].mxu0 }
 0x106   : > { %v412_v28 = vmax.f32 %v408_v20, %v376_v27  ;;  %v971_v29 = vpop.f32.mrb[10].mxu0 }
 0x107   : > { %v415_v30 = vmax.f32 %v411_v22, %v971_v29  ;;  %v379_v31 = vpop.f32.mrb[11].mxu0 }
 0x108   : > { %v413_v32 = vmax.f32 %v409_v24, %v379_v31 }
 0x10c   : > { %v974_v33 = vpop.f32.mrb[12].mxu0 }
 0x10d   : > { %v418_v34 = vmax.f32 %v414_v26, %v974_v33  ;;  %v392_v35 = vpop.f32.mrb[13].mxu0 }
 0x10e   : > { %v416_v36 = vmax.f32 %v412_v28, %v392_v35  ;;  %v977_v37 = vpop.f32.mrb[14].mxu0 }
 0x10f   : > { %v419_v38 = vmax.f32 %v415_v30, %v977_v37  ;;  %v395_v39 = vpop.f32.mrb[15].mxu0 }
 0x110   : > { %v417_v40 = vmax.f32 %v413_v32, %v395_v39 }
 0x111   : > { %v421_v41 = vmax.f32 %v418_v34, %v419_v38 }
 0x112   : > { %v420_v42 = vmax.f32 %v416_v36, %v417_v40 }
 0x114   : > { %v422_v43 = vmax.f32 %v420_v42, %v421_v41 }
 0x116   : > { %v423_v44 = vrot.slane %v422_v43, 4 }
 0x118   : > { %v424_v45 = vmax.f32 %v422_v43, %v423_v44 }
 0x11a   : > { %v425_v47 = vrot.slane %v424_v45, 2 }
 0x11c   : > { %v426_v48 = vmax.f32 %v424_v45, %v425_v47 }
 0x11e   : > { %v427_v50 = vrot.slane %v426_v48, 1 }
 0x120   : > { %v428_v52 = vmax.f32 %v426_v48, %v427_v50 }
 0x122   : > { %v429_v54 = vmax.f32 %v407_v51, %v428_v52 }
 0x124   : > { %v437_v55 = vrot.slane %v429_v54, %v980_v53  ;;  %546 = vst [vmem:[#allocation2] sm:$0x1] %v429_v54  ;;  %v430_v56 = vsub.f32 %v407_v51, %v429_v54  ;;  %v503_v54 = vld [vmem:[%s941_s9] sm:$0xf] }
 0x126   : > { %v452_v57 = vsub.f32 %v395_v39, %v437_v55  ;;  %v439_v58 = vsub.f32 %v344_v14, %v437_v55  ;;  %v440_v59 = vsub.f32 %v347_v16, %v437_v55  ;;  %v441_v60 = vsub.f32 %v703_v13, %v437_v55 }
 0x127   : > { %v442_v61 = vsub.f32 %v704_v15, %v437_v55  ;;  %v443_v62 = vsub.f32 %v360_v19, %v437_v55  ;;  %v444_v63 = vsub.f32 %v363_v23, %v437_v55  ;;  %v445_v0 = vsub.f32 %v962_v17, %v437_v55 }
 0x128   : > { %v481_v1 = vmul.f32 1.442695, %v452_v57  ;;  %v455_v2 = vmul.f32 1.442695, %v439_v58  ;;  %v457_v3 = vmul.f32 1.442695, %v440_v59  ;;  %v446_v4 = vsub.f32 %v965_v21, %v437_v55 }
 0x129   : > { %v459_v5 = vmul.f32 1.442695, %v441_v60  ;;  %v447_v6 = vsub.f32 %v376_v27, %v437_v55  ;;  %v461_v7 = vmul.f32 1.442695, %v442_v61  ;;  %v463_v8 = vmul.f32 1.442695, %v443_v62 }
 0x12a   : > { %790 = vpow2.f32 %v481_v1  ;;  %v465_v9 = vmul.f32 1.442695, %v444_v63  ;;  %v448_v10 = vsub.f32 %v379_v31, %v437_v55  ;;  %v449_v11 = vsub.f32 %v968_v25, %v437_v55 }
 0x12b   : > { %792 = vpow2.f32 %v455_v2  ;;  %v450_v13 = vsub.f32 %v971_v29, %v437_v55  ;;  %v451_v14 = vsub.f32 %v392_v35, %v437_v55  ;;  %v453_v15 = vsub.f32 %v974_v33, %v437_v55 }
 0x12c   : > { %794 = vpow2.f32 %v457_v3  ;;  %v467_v16 = vmul.f32 1.442695, %v445_v0  ;;  %v454_v17 = vsub.f32 %v977_v37, %v437_v55  ;;  %v469_v18 = vmul.f32 1.442695, %v446_v4  ;;  %v495_v55 = vld [vmem:[#allocation3] sm:$0xff] }
 0x12d   : > { %796 = vpow2.f32 %v459_v5  ;;  %v471_v19 = vmul.f32 1.442695, %v447_v6  ;;  %v473_v20 = vmul.f32 1.442695, %v448_v10  ;;  %v475_v21 = vmul.f32 1.442695, %v449_v11 }
 0x12e   : > { %798 = vpow2.f32 %v461_v7  ;;  %v477_v22 = vmul.f32 1.442695, %v450_v13  ;;  %v479_v23 = vmul.f32 1.442695, %v451_v14  ;;  %v483_v25 = vmul.f32 1.442695, %v453_v15 }
 0x12f   : > { %800 = vpow2.f32 %v463_v8  ;;  %v485_v27 = vmul.f32 1.442695, %v454_v17  ;;  %v431_v29 = vmul.f32 1.442695, %v430_v56 }
 0x130   : > { %802 = vpow2.f32 %v465_v9 }
 0x131   : > { %804 = vpow2.f32 %v467_v16 }
 0x132   : > { %806 = vpow2.f32 %v469_v18 }
 0x133   : > { %808 = vpow2.f32 %v471_v19 }
 0x134   : > { %v791_v24 = vpop.eup %790  ;;  %810 = vpow2.f32 %v473_v20 }
 0x135   : > { %v793_v26 = vpop.eup %792  ;;  %812 = vpow2.f32 %v475_v21 }
 0x136   : > { %v795_v28 = vpop.eup %794  ;;  %814 = vpow2.f32 %v477_v22 }
 0x137   : > { %v797_v30 = vpop.eup %796  ;;  %v487_v31 = vpack.c.bf16 %v795_v28, %v793_v26  ;;  %816 = vpow2.f32 %v479_v23 }
 0x138   : > { %v799_v32 = vpop.eup %798  ;;  %818 = vpow2.f32 %v483_v25 }
 0x139   : > { %v801_v33 = vpop.eup %800  ;;  %718 = vmatpush3.bf16.msra.mxu1 %v487_v31  ;;  %v488_v34 = vpack.c.bf16 %v799_v32, %v797_v30  ;;  %820 = vpow2.f32 %v485_v27 }
 0x13a   : > { %v803_v35 = vpop.eup %802  ;;  %719 = vmatprep.subr.bf16.mxu1 %v868_v12  ;;  %822 = vpow2.f32 %v431_v29 }
 0x13b   : > { %v805_v36 = vpop.eup %804  ;;  %v489_v37 = vpack.c.bf16 %v803_v35, %v801_v33 }
 0x13c   : > { %v807_v38 = vpop.eup %806 }
 0x13d   : > { %v809_v39 = vpop.eup %808  ;;  %720 = vmatpush3.bf16.msra.mxu1 %v488_v34  ;;  %v490_v40 = vpack.c.bf16 %v807_v38, %v805_v36 }
 0x13e   : > { %v811_v41 = vpop.eup %810  ;;  %721 = vmatprep.subr.bf16.mxu1 %v868_v12 }
 0x13f   : > { %v813_v42 = vpop.eup %812  ;;  %v491_v43 = vpack.c.bf16 %v811_v41, %v809_v39 }
 0x140   : > { %v815_v44 = vpop.eup %814 }
 0x141   : > { %v817_v45 = vpop.eup %816  ;;  %722 = vmatpush3.bf16.msra.mxu1 %v489_v37  ;;  %v492_v46 = vpack.c.bf16 %v815_v44, %v813_v42 }
 0x142   : > { %v819_v47 = vpop.eup %818  ;;  %723 = vmatprep.subr.bf16.mxu1 %v868_v12  ;;  %v493_v48 = vpack.c.bf16 %v791_v24, %v817_v45 }
 0x143   : > { %v821_v49 = vpop.eup %820 }
 0x144   : > { %v823_v50 = vpop.eup %822  ;;  %v494_v51 = vpack.c.bf16 %v821_v49, %v819_v47 }
 0x145   : > { %724 = vmatpush3.bf16.msra.mxu1 %v490_v40  ;;  %v500_v52 = vrot.slane %v823_v50, %v980_v53 }
 0x146   : > { %725 = vmatprep.subr.bf16.mxu1 %v868_v12 }
 0x147   : > { %v502_v56 = vmul.f32 %v500_v52, %v495_v55 }
 0x149   : > { %726 = vmatpush3.bf16.msra.mxu1 %v491_v43 }
 0x14a   : > { %727 = vmatprep.subr.bf16.mxu1 %v868_v12 }
 0x14d   : > { %728 = vmatpush3.bf16.msra.mxu1 %v492_v46 }
 0x14e   : > { %729 = vmatprep.subr.bf16.mxu1 %v868_v12 }
 0x151   : > { %730 = vmatpush3.bf16.msra.mxu1 %v493_v48 }
 0x152   : > { %731 = vmatprep.subr.bf16.mxu1 %v868_v12 }
 0x155   : > { %732 = vmatpush3.bf16.msra.mxu1 %v494_v51 }
 0x158   : > { %734 = vmatmul.mubr.bf16.vlgmr.msra.gmra.mrb[0].mxu1 %v503_v54 }
 0x228   : > { %550 = sbr.rel (%p678_p9) target bundleno = 588 (0x24c), region = 40 }
 0x22b   : > { %v538_v57 = vpop.f32.mrb[0].mxu1 }
 0x22c   : > { %v544_v58 = vadd.f32 %v538_v57, %v502_v56  ;;  %v735_v59 = vpop.f32.mrb[1].mxu1 }
 0x22d   : > { %v541_v60 = vpop.f32.mrb[2].mxu1 }
 0x22e   : > { %545 = vst [vmem:[#allocation3] sm:$0xff] %v544_v58  ;;  %v736_v61 = vpop.f32.mrb[3].mxu1 }
 0x235   : > { %v551_v62 = vld [vmem:[#allocation3 + $0x4] sm:$0x1] }
 0x236   : > { %824 = vrcp.f32 %v551_v62  ;;  %v556_v2 = vld [vmem:[#allocation3] sm:$0xff] }
 0x240   : > { %v825_v63 = vpop.eup %824 }
 0x241   : > { %v553_v0 = vmul.f32 %v825_v63, %v551_v62 }
 0x243   : > { %v554_v12 = vsub.f32 2.0, %v553_v0 }
 0x245   : > { %v555_v1 = vmul.f32 %v825_v63, %v554_v12 }
 0x247   : > { %v560_v3 = vrot.slane %v555_v1, %v980_v53 }
 0x249   : > { %v561_v4 = vmul.f32 %v560_v3, %v556_v2 }
 0x24b   : > { %562 = vst [vmem:[%s935_s4] sm:$0xff] %v561_v4 }
 0x24c PF: > { %s13_s16 = sadd.s32 1, %s864_s16   ;;  %s1020_s12 = smov %s856_s14 }
 0x24d   : > { %p10_p10 = scmp.ge.s32.totalorder %s13_s16, 18   ;;  %s1021_s13 = smov %s860_s15 }
 0x24e   : > { %s1022_s14 = smov %s1025_s17  ;;  %s1023_s15 = smov %s1029_s18 }
 0x24f   :  { %12 = sbr.rel (!%p10_p10) target bundleno = 3 (0x3), region = 76 }

// kernel: depth_correlation_forward.2
= control target key start
LH: loop header
LB: loop body
LE: loop exit
PB: predicated region body
PF: predicated region fallthrough
CT: control target
= control target key end

     0   :  { %s1569_s13 = smov 0   ;;  %s1755_s0 = inlined_call_operand.vmem [shape: f32[8,512], index: 0, kind: input, shape index: {}]   ;;  %s1756_s1 = inlined_call_operand.vmem [shape: f32[8,512], index: 1, kind: input, shape index: {}]   ;;  %s1757_s2 = inlined_call_operand.vmem [shape: f32[8,8], index: 2, kind: input, shape index: {}]   ;;  %s1758_s3 = inlined_call_operand.vmem [shape: f32[8,1], index: 3, kind: input, shape index: {}]   ;;  %s1759_s4 = inlined_call_operand.vmem [shape: f32[8,8], index: 4, kind: input, shape index: {}]   ;;  %s1760_s5 = inlined_call_operand.vmem [shape: f32[8,1], index: 5, kind: input, shape index: {}]   ;;  %s1761_s6 = inlined_call_operand.vmem [shape: f32[8,8], index: 6, kind: input, shape index: {}]   ;;  %s1762_s7 = inlined_call_operand.vmem [shape: f32[1,8], index: 7, kind: input, shape index: {}]   ;;  %s1763_s8 = inlined_call_operand.vmem [shape: bf16[8,512], index: 8, kind: output, shape index: {0}]   ;;  %s1764_s9 = inlined_call_operand.vmem [shape: bf16[512,8], index: 9, kind: output, shape index: {1}]   ;;  %s1765_s10 = inlined_call_operand.vmem [shape: bf16[8,512], index: 10, kind: output, shape index: {2}]  }
   0x1 LB: > { %s1287_s14 = sadd.s32 4294967295, %s1510_s13   ;;  %p1291_p0 = scmp.ge.s32.totalorder %s1510_s13, 1  ;;  %s1510_s13 = sphi %s1569_s13, %s21_s13  }
   0x2   : > { %p329_p1 = scmp.lt.s32.totalorder %s1510_s13, 3 }
   0x4   : > { %p330_p2 = pnand %p1291_p0, %p329_p1 }
   0x5   : > { %s1292_s15 = sshll.u32 (!%p330_p2), %s1287_s14, 1  ;;  %v1512_v0 = vmov (!%p330_p2), 0.0   ;;  %v416_v3 = vld [vmem:[%s1759_s4] sm:$0xff] (!%p330_p2)  ;;  %vm423_vm0 = vcmask (!%p330_p2), 64512   ;;  %v1513_v9 = vmov (!%p330_p2), 0   ;;  %vm1118_vm1 = vcmask (!%p330_p2), 60416  }
   0x6   : > { %333 = sbr.rel (%p330_p2) target bundleno = 488 (0x1e8), region = 52  ;;  %p383_p3 = scmp.lt.s32.totalorder (!%p330_p2), %s1292_s15, 3  ;;  %491 = vmatprep.mubr.f32.mxu0 (!%p330_p2), %v1512_v0  ;;  %572 = vmatprep.mubr.f32.mxu1 (!%p330_p2), %v1512_v0  ;;  %v579_v4 = vld [vmem:[%s1761_s6] sm:$0xff] (!%p330_p2) }
   0x7   : > { %v498_v7 = vld [vmem:[%s1757_s2] sm:$0xff] (!%p330_p2)  ;;  %1502 = vset.pattern.permute.xlu1 (!%p330_p2), %v1513_v9 }
   0x8   : > { %v417_v8 = vld [vmem:[%s1760_s5] sm:$0xff] (!%p330_p2) }
   0x9   : > { %420 = vperm.xlu1 (!%p330_p2), %1502, %v417_v8   ;;  %v499_v11 = vld [vmem:[%s1758_s3] sm:$0xff] (!%p330_p2) }
   0xa   : > { %v1649_v55 = vld [vmem:[%s1762_s7] ss:$0 sm:$0xff] (!%p330_p2) }
   0xd   : > { %s1767_s15 = smov (!%p383_p3, %s1292_s15), 3  ;;  %502 = vperm.xlu1 %1502, %v499_v11  }
   0xe   : > { %s1293_s16 = sshll.u32 %s1767_s15, 3 }
   0xf   : > { %s392_s19 = scalar_lea.vmem %s1756_s1, %s1293_s16  ;;  %s386_s26 = scalar_lea.vmem %s1755_s0, %s1293_s16 }
  0x10   : > { %v412_v1 = vld [vmem:[%s392_s19] sm:$0xff]  ;;  %v413_v2 = vld [vmem:[%s392_s19 + $0x8] sm:$0xff]  ;;  %s1297_s16 = sshll.u32 %s1767_s15, 2  ;;  %s1298_s15 = sshll.u32 %s1287_s14, 5 }
  0x11   : > { %587 = vxpose.xlu0.b32.start.end [1/1] (short) %v412_v1, 128  ;;  %427 = vmatprep.subr.mxu0 %v413_v2  ;;  %v415_v5 = vld [vmem:[%s386_s26 + $0x8] sm:$0xff]  ;;  %v414_v6 = vld [vmem:[%s386_s26] sm:$0xff]  ;;  %s398_s19 = scalar_lea.vmem %s1763_s8, %s1297_s16  ;;  %s410_s22 = scalar_lea.vmem %s1765_s10, %s1297_s16 }
  0x12   : > { %428 = vmatpush1.msra.mxu0 %v412_v1  ;;  %508 = vmatprep.subr.mxu1 %v415_v5  ;;  %p401_p4 = scmp.lt.s32.totalorder %s1298_s15, 63 }
  0x13   : > { %1302 = vmatmul.mubr.msk.f32.vlgmr.msra.gmra.mrb[0].mxu0 %vm423_vm0, %v416_v3  ;;  %1440 = vmatprep.subr.mxu0 %v579_v4 }
  0x14   : > { %1441 = vmatpush3.msra.mxu0 %v579_v4  ;;  %509 = vmatpush1.msra.mxu1 %v414_v6  ;;  %s1769_s15 = smov (!%p401_p4, %s1298_s15), 63 }
  0x15   : > { %1303 = vmatmul.mubr.msk.f32.vlgmr.msra.gmra.mrb[0].mxu1 %vm423_vm0, %v498_v7  ;;  %1490 = vmatprep.subr.mxu1 %v579_v4  ;;  %s1299_s25 = sshll.u32 %s1769_s15, 2 }
  0x16   : > { %1491 = vmatpush3.msra.mxu1 %v579_v4  ;;  %s1655_s28 = scalar_lea.vmem %s1764_s9, %s1299_s25 }
  0x4e   : > { %619 = vxpose.xlu0.b32.start.end [1/1] (short) %v413_v2, 128 }
  0x77   : > { %1503 = vset.pattern.permute.xlu0 %v1513_v9 }
  0x88   : > { %v421_v47 = vpop.permute.xlu1 %420 }
  0x8c   : > { %v503_v51 = vpop.permute.xlu1 %502 }
  0x91   : > { %v603_v10 = vpop.trf.xlu0 }
  0x92   : > { %1442 = vmatprep.mubr.msk.f32.mxu0 %vm423_vm0, %v603_v10 }
  0x95   : > { %v604_v12 = vpop.trf.xlu0 }
  0x96   : > { %1443 = vmatmul.mubr.msk.f32.vlgmr.msra.gmra.mrb[2].mxu0 %vm423_vm0, %v604_v12 }
  0x99   : > { %v605_v13 = vpop.trf.xlu0 }
  0x9a   : > { %1445 = vmatprep.mubr.msk.f32.mxu0 %vm423_vm0, %v605_v13 }
  0x9d   : > { %v606_v14 = vpop.trf.xlu0 }
  0x9e   : > { %1446 = vmatmul.mubr.msk.f32.gmra.mrb[4].mxu0 %vm423_vm0, %v606_v14 }
  0xa1   : > { %v607_v15 = vpop.trf.xlu0 }
  0xa2   : > { %1448 = vmatprep.mubr.msk.f32.mxu0 %vm423_vm0, %v607_v15 }
  0xa5   : > { %v608_v16 = vpop.trf.xlu0 }
  0xa6   : > { %1449 = vmatmul.mubr.msk.f32.gmra.mrb[6].mxu0 %vm423_vm0, %v608_v16 }
  0xa9   : > { %v609_v17 = vpop.trf.xlu0 }
  0xaa   : > { %1451 = vmatprep.mubr.msk.f32.mxu0 %vm423_vm0, %v609_v17 }
  0xad   : > { %v610_v18 = vpop.trf.xlu0 }
  0xae   : > { %1452 = vmatmul.mubr.msk.f32.gmra.mrb[8].mxu0 %vm423_vm0, %v610_v18 }
  0xb1   : > { %v611_v19 = vpop.trf.xlu0 }
  0xb2   : > { %1454 = vmatprep.mubr.msk.f32.mxu0 %vm423_vm0, %v611_v19 }
  0xb5   : > { %v612_v20 = vpop.trf.xlu0 }
  0xb6   : > { %1455 = vmatmul.mubr.msk.f32.gmra.mrb[10].mxu0 %vm423_vm0, %v612_v20 }
  0xb9   : > { %v613_v21 = vpop.trf.xlu0 }
  0xba   : > { %1457 = vmatprep.mubr.msk.f32.mxu0 %vm423_vm0, %v613_v21 }
  0xbd   : > { %v614_v22 = vpop.trf.xlu0 }
  0xbe   : > { %1458 = vmatmul.mubr.msk.f32.gmra.mrb[12].mxu0 %vm423_vm0, %v614_v22 }
  0xc1   : > { %v615_v23 = vpop.trf.xlu0 }
  0xc2   : > { %1460 = vmatprep.mubr.msk.f32.mxu0 %vm423_vm0, %v615_v23 }
  0xc5   : > { %v616_v24 = vpop.trf.xlu0 }
  0xc6   : > { %1461 = vmatmul.mubr.msk.f32.gmra.mrb[14].mxu0 %vm423_vm0, %v616_v24 }
  0xc9   : > { %v617_v25 = vpop.trf.xlu0 }
  0xca   : > { %1463 = vmatprep.mubr.msk.f32.mxu0 %vm423_vm0, %v617_v25 }
  0xcd   : > { %v618_v26 = vpop.trf.xlu0 }
  0xce   : > { %1464 = vmatmul.mubr.msk.f32.gmra.mrb[16].mxu0 %vm423_vm0, %v618_v26 }
  0xd1   : > { %v635_v27 = vpop.trf.xlu0 }
  0xd2   : > { %1466 = vmatprep.mubr.msk.f32.mxu1 %vm423_vm0, %v635_v27 }
  0xd5   : > { %v636_v28 = vpop.trf.xlu0 }
  0xd6   : > { %1467 = vmatmul.mubr.msk.f32.vlgmr.msra.gmra.mrb[2].mxu1 %vm423_vm0, %v636_v28 }
  0xd9   : > { %v637_v29 = vpop.trf.xlu0 }
  0xda   : > { %1469 = vmatprep.mubr.msk.f32.mxu1 %vm423_vm0, %v637_v29 }
  0xdd   : > { %v638_v30 = vpop.trf.xlu0 }
  0xde   : > { %1470 = vmatmul.mubr.msk.f32.gmra.mrb[4].mxu1 %vm423_vm0, %v638_v30 }
  0xe1   : > { %v639_v31 = vpop.trf.xlu0 }
  0xe2   : > { %1472 = vmatprep.mubr.msk.f32.mxu1 %vm423_vm0, %v639_v31 }
  0xe5   : > { %v640_v32 = vpop.trf.xlu0 }
  0xe6   : > { %1473 = vmatmul.mubr.msk.f32.gmra.mrb[6].mxu1 %vm423_vm0, %v640_v32  ;;  %v493_v33 = vpop.f32.mrb[0].mxu0 }
  0xe7   : > { %v495_v34 = vpop.f32.mrb[1].mxu0  ;;  %v494_v48 = vadd.f32 %v493_v33, %v421_v47 }
  0xe8   : > { %v574_v45 = vpop.f32.mrb[0].mxu1  ;;  %v496_v49 = vadd.f32 %v495_v34, %v421_v47 }
  0xe9   : > { %v641_v35 = vpop.trf.xlu0  ;;  %v576_v46 = vpop.f32.mrb[1].mxu1  ;;  %v575_v52 = vadd.f32 %v574_v45, %v503_v51 }
  0xea   : > { %1475 = vmatprep.mubr.msk.f32.mxu1 %vm423_vm0, %v641_v35  ;;  %v1373_v50 = vpack.c.bf16 %v496_v49, %v494_v48  ;;  %v577_v53 = vadd.f32 %v576_v46, %v503_v51 }
  0xec   : > { %980 = vst [vmem:[%s398_s19] sm:$0xff] %v1373_v50  ;;  %v1374_v54 = vpack.c.bf16 %v577_v53, %v575_v52 }
  0xed   : > { %v642_v36 = vpop.trf.xlu0 }
  0xee   : > { %1476 = vmatmul.mubr.msk.f32.gmra.mrb[8].mxu1 %vm423_vm0, %v642_v36  ;;  %989 = vst [vmem:[%s410_s22] sm:$0xff] %v1374_v54 }
  0xf1   : > { %v643_v37 = vpop.trf.xlu0 }
  0xf2   : > { %1478 = vmatprep.mubr.msk.f32.mxu1 %vm423_vm0, %v643_v37 }
  0xf5   : > { %v644_v38 = vpop.trf.xlu0 }
  0xf6   : > { %1479 = vmatmul.mubr.msk.f32.gmra.mrb[10].mxu1 %vm423_vm0, %v644_v38 }
  0xf9   : > { %v645_v39 = vpop.trf.xlu0 }
  0xfa   : > { %1481 = vmatprep.mubr.msk.f32.mxu1 %vm423_vm0, %v645_v39 }
  0xfd   : > { %v646_v40 = vpop.trf.xlu0 }
  0xfe   : > { %1482 = vmatmul.mubr.msk.f32.gmra.mrb[12].mxu1 %vm423_vm0, %v646_v40 }
 0x101   : > { %v647_v41 = vpop.trf.xlu0 }
 0x102   : > { %1484 = vmatprep.mubr.msk.f32.mxu1 %vm423_vm0, %v647_v41 }
 0x105   : > { %v648_v42 = vpop.trf.xlu0 }
 0x106   : > { %1485 = vmatmul.mubr.msk.f32.gmra.mrb[14].mxu1 %vm423_vm0, %v648_v42 }
 0x109   : > { %v649_v43 = vpop.trf.xlu0 }
 0x10a   : > { %1487 = vmatprep.mubr.msk.f32.mxu1 %vm423_vm0, %v649_v43 }
 0x10d   : > { %v650_v44 = vpop.trf.xlu0 }
 0x10e   : > { %1488 = vmatmul.mubr.msk.f32.gmra.mrb[16].mxu1 %vm423_vm0, %v650_v44 }
 0x169   : > { %v1444_v56 = vpop.f32.mrb[2].mxu0 }
 0x16a   : > { %v819_v57 = vadd.f32 %v1444_v56, %v1649_v55  ;;  %v813_v58 = vpop.f32.mrb[3].mxu0 }
 0x16b   : > { %v814_v59 = vadd.f32 %v1649_v55, %v813_v58 }
 0x16c   : > { %v1376_v60 = vpack.c.bf16 %v819_v57, %v819_v57 }
 0x16d   : > { %v1375_v61 = vpack.c.bf16 %v814_v59, %v814_v59 }
 0x16e   : > { %1120 = vst.msk [vmem:[%s1655_s28 + $0x4] sm:$0xf] %vm1118_vm1, %v1376_v60 }
 0x16f   : > { %1119 = vst.msk [vmem:[%s1655_s28] sm:$0xf] %vm1118_vm1, %v1375_v61 }
 0x171   : > { %v1447_v62 = vpop.f32.mrb[4].mxu0 }
 0x172   : > { %v829_v63 = vadd.f32 %v1447_v62, %v1649_v55  ;;  %v823_v0 = vpop.f32.mrb[5].mxu0 }
 0x173   : > { %v824_v1 = vadd.f32 %v1649_v55, %v823_v0 }
 0x174   : > { %v1378_v2 = vpack.c.bf16 %v829_v63, %v829_v63 }
 0x175   : > { %v1377_v3 = vpack.c.bf16 %v824_v1, %v824_v1 }
 0x176   : > { %1122 = vst.msk [vmem:[%s1655_s28 + $0xc] sm:$0xf] %vm1118_vm1, %v1378_v2 }
 0x177   : > { %1121 = vst.msk [vmem:[%s1655_s28 + $0x8] sm:$0xf] %vm1118_vm1, %v1377_v3 }
 0x179   : > { %v1450_v4 = vpop.f32.mrb[6].mxu0 }
 0x17a   : > { %v839_v5 = vadd.f32 %v1450_v4, %v1649_v55  ;;  %v833_v6 = vpop.f32.mrb[7].mxu0 }
 0x17b   : > { %v834_v7 = vadd.f32 %v1649_v55, %v833_v6 }
 0x17c   : > { %v1380_v8 = vpack.c.bf16 %v839_v5, %v839_v5 }
 0x17d   : > { %v1379_v9 = vpack.c.bf16 %v834_v7, %v834_v7 }
 0x17e   : > { %1124 = vst.msk [vmem:[%s1655_s28 + $0x14] sm:$0xf] %vm1118_vm1, %v1380_v8 }
 0x17f   : > { %1123 = vst.msk [vmem:[%s1655_s28 + $0x10] sm:$0xf] %vm1118_vm1, %v1379_v9 }
 0x181   : > { %v1453_v10 = vpop.f32.mrb[8].mxu0 }
 0x182   : > { %v849_v11 = vadd.f32 %v1453_v10, %v1649_v55  ;;  %v843_v12 = vpop.f32.mrb[9].mxu0 }
 0x183   : > { %v844_v13 = vadd.f32 %v1649_v55, %v843_v12 }
 0x184   : > { %v1382_v14 = vpack.c.bf16 %v849_v11, %v849_v11 }
 0x185   : > { %v1381_v15 = vpack.c.bf16 %v844_v13, %v844_v13 }
 0x186   : > { %1126 = vst.msk [vmem:[%s1655_s28 + $0x1c] sm:$0xf] %vm1118_vm1, %v1382_v14 }
 0x187   : > { %1125 = vst.msk [vmem:[%s1655_s28 + $0x18] sm:$0xf] %vm1118_vm1, %v1381_v15 }
 0x189   : > { %v1456_v16 = vpop.f32.mrb[10].mxu0 }
 0x18a   : > { %v859_v17 = vadd.f32 %v1456_v16, %v1649_v55  ;;  %v853_v18 = vpop.f32.mrb[11].mxu0 }
 0x18b   : > { %v854_v19 = vadd.f32 %v1649_v55, %v853_v18 }
 0x18c   : > { %v1384_v20 = vpack.c.bf16 %v859_v17, %v859_v17 }
 0x18d   : > { %v1383_v21 = vpack.c.bf16 %v854_v19, %v854_v19 }
 0x18e   : > { %1128 = vst.msk [vmem:[%s1655_s28 + $0x24] sm:$0xf] %vm1118_vm1, %v1384_v20 }
 0x18f   : > { %1127 = vst.msk [vmem:[%s1655_s28 + $0x20] sm:$0xf] %vm1118_vm1, %v1383_v21 }
 0x191   : > { %v1459_v22 = vpop.f32.mrb[12].mxu0 }
 0x192   : > { %v869_v23 = vadd.f32 %v1459_v22, %v1649_v55  ;;  %v863_v24 = vpop.f32.mrb[13].mxu0 }
 0x193   : > { %v864_v25 = vadd.f32 %v1649_v55, %v863_v24 }
 0x194   : > { %v1386_v26 = vpack.c.bf16 %v869_v23, %v869_v23 }
 0x195   : > { %v1385_v27 = vpack.c.bf16 %v864_v25, %v864_v25 }
 0x196   : > { %1130 = vst.msk [vmem:[%s1655_s28 + $0x2c] sm:$0xf] %vm1118_vm1, %v1386_v26 }
 0x197   : > { %1129 = vst.msk [vmem:[%s1655_s28 + $0x28] sm:$0xf] %vm1118_vm1, %v1385_v27 }
 0x199   : > { %v1462_v28 = vpop.f32.mrb[14].mxu0 }
 0x19a   : > { %v879_v29 = vadd.f32 %v1462_v28, %v1649_v55  ;;  %v873_v30 = vpop.f32.mrb[15].mxu0 }
 0x19b   : > { %v874_v31 = vadd.f32 %v1649_v55, %v873_v30 }
 0x19c   : > { %v1388_v32 = vpack.c.bf16 %v879_v29, %v879_v29 }
 0x19d   : > { %v1387_v33 = vpack.c.bf16 %v874_v31, %v874_v31 }
 0x19e   : > { %1132 = vst.msk [vmem:[%s1655_s28 + $0x34] sm:$0xf] %vm1118_vm1, %v1388_v32 }
 0x19f   : > { %1131 = vst.msk [vmem:[%s1655_s28 + $0x30] sm:$0xf] %vm1118_vm1, %v1387_v33 }
 0x1a1   : > { %v1465_v34 = vpop.f32.mrb[16].mxu0 }
 0x1a2   : > { %v889_v35 = vadd.f32 %v1465_v34, %v1649_v55  ;;  %v883_v36 = vpop.f32.mrb[17].mxu0 }
 0x1a3   : > { %v884_v37 = vadd.f32 %v1649_v55, %v883_v36 }
 0x1a4   : > { %v1390_v38 = vpack.c.bf16 %v889_v35, %v889_v35 }
 0x1a5   : > { %v1389_v39 = vpack.c.bf16 %v884_v37, %v884_v37 }
 0x1a6   : > { %1134 = vst.msk [vmem:[%s1655_s28 + $0x3c] sm:$0xf] %vm1118_vm1, %v1390_v38 }
 0x1a7   : > { %1133 = vst.msk [vmem:[%s1655_s28 + $0x38] sm:$0xf] %vm1118_vm1, %v1389_v39 }
 0x1a9   : > { %v1468_v40 = vpop.f32.mrb[2].mxu1 }
 0x1aa   : > { %v899_v41 = vadd.f32 %v1468_v40, %v1649_v55  ;;  %v893_v42 = vpop.f32.mrb[3].mxu1 }
 0x1ab   : > { %v894_v43 = vadd.f32 %v1649_v55, %v893_v42 }
 0x1ac   : > { %v1392_v44 = vpack.c.bf16 %v899_v41, %v899_v41 }
 0x1ad   : > { %v1391_v45 = vpack.c.bf16 %v894_v43, %v894_v43 }
 0x1ae   : > { %1136 = vst.msk [vmem:[%s1655_s28 + $0x44] sm:$0xf] %vm1118_vm1, %v1392_v44 }
 0x1af   : > { %1135 = vst.msk [vmem:[%s1655_s28 + $0x40] sm:$0xf] %vm1118_vm1, %v1391_v45 }
 0x1b1   : > { %v1471_v46 = vpop.f32.mrb[4].mxu1 }
 0x1b2   : > { %v909_v47 = vadd.f32 %v1471_v46, %v1649_v55  ;;  %v903_v48 = vpop.f32.mrb[5].mxu1 }
 0x1b3   : > { %v904_v49 = vadd.f32 %v1649_v55, %v903_v48 }
 0x1b4   : > { %v1394_v50 = vpack.c.bf16 %v909_v47, %v909_v47 }
 0x1b5   : > { %v1393_v51 = vpack.c.bf16 %v904_v49, %v904_v49 }
 0x1b6   : > { %1138 = vst.msk [vmem:[%s1655_s28 + $0x4c] sm:$0xf] %vm1118_vm1, %v1394_v50 }
 0x1b7   : > { %1137 = vst.msk [vmem:[%s1655_s28 + $0x48] sm:$0xf] %vm1118_vm1, %v1393_v51 }
 0x1b9   : > { %v1474_v52 = vpop.f32.mrb[6].mxu1 }
 0x1ba   : > { %v919_v53 = vadd.f32 %v1474_v52, %v1649_v55  ;;  %v913_v54 = vpop.f32.mrb[7].mxu1 }
 0x1bb   : > { %v914_v56 = vadd.f32 %v1649_v55, %v913_v54 }
 0x1bc   : > { %v1396_v57 = vpack.c.bf16 %v919_v53, %v919_v53 }
 0x1bd   : > { %v1395_v58 = vpack.c.bf16 %v914_v56, %v914_v56 }
 0x1be   : > { %1140 = vst.msk [vmem:[%s1655_s28 + $0x54] sm:$0xf] %vm1118_vm1, %v1396_v57 }
 0x1bf   : > { %1139 = vst.msk [vmem:[%s1655_s28 + $0x50] sm:$0xf] %vm1118_vm1, %v1395_v58 }
 0x1c1   : > { %v1477_v59 = vpop.f32.mrb[8].mxu1 }
 0x1c2   : > { %v929_v60 = vadd.f32 %v1477_v59, %v1649_v55  ;;  %v923_v61 = vpop.f32.mrb[9].mxu1 }
 0x1c3   : > { %v924_v62 = vadd.f32 %v1649_v55, %v923_v61 }
 0x1c4   : > { %v1398_v63 = vpack.c.bf16 %v929_v60, %v929_v60 }
 0x1c5   : > { %v1397_v0 = vpack.c.bf16 %v924_v62, %v924_v62 }
 0x1c6   : > { %1142 = vst.msk [vmem:[%s1655_s28 + $0x5c] sm:$0xf] %vm1118_vm1, %v1398_v63 }
 0x1c7   : > { %1141 = vst.msk [vmem:[%s1655_s28 + $0x58] sm:$0xf] %vm1118_vm1, %v1397_v0 }
 0x1c9   : > { %v1480_v1 = vpop.f32.mrb[10].mxu1 }
 0x1ca   : > { %v939_v2 = vadd.f32 %v1480_v1, %v1649_v55  ;;  %v933_v3 = vpop.f32.mrb[11].mxu1 }
 0x1cb   : > { %v934_v4 = vadd.f32 %v1649_v55, %v933_v3 }
 0x1cc   : > { %v1400_v5 = vpack.c.bf16 %v939_v2, %v939_v2 }
 0x1cd   : > { %v1399_v6 = vpack.c.bf16 %v934_v4, %v934_v4 }
 0x1ce   : > { %1144 = vst.msk [vmem:[%s1655_s28 + $0x64] sm:$0xf] %vm1118_vm1, %v1400_v5 }
 0x1cf   : > { %1143 = vst.msk [vmem:[%s1655_s28 + $0x60] sm:$0xf] %vm1118_vm1, %v1399_v6 }
 0x1d1   : > { %v1483_v7 = vpop.f32.mrb[12].mxu1 }
 0x1d2   : > { %v949_v8 = vadd.f32 %v1483_v7, %v1649_v55  ;;  %v943_v9 = vpop.f32.mrb[13].mxu1 }
 0x1d3   : > { %v944_v10 = vadd.f32 %v1649_v55, %v943_v9 }
 0x1d4   : > { %v1402_v11 = vpack.c.bf16 %v949_v8, %v949_v8 }
 0x1d5   : > { %v1401_v12 = vpack.c.bf16 %v944_v10, %v944_v10 }
 0x1d6   : > { %1146 = vst.msk [vmem:[%s1655_s28 + $0x6c] sm:$0xf] %vm1118_vm1, %v1402_v11 }
 0x1d7   : > { %1145 = vst.msk [vmem:[%s1655_s28 + $0x68] sm:$0xf] %vm1118_vm1, %v1401_v12 }
 0x1d9   : > { %v1486_v13 = vpop.f32.mrb[14].mxu1 }
 0x1da   : > { %v959_v14 = vadd.f32 %v1486_v13, %v1649_v55  ;;  %v953_v15 = vpop.f32.mrb[15].mxu1 }
 0x1db   : > { %v954_v16 = vadd.f32 %v1649_v55, %v953_v15 }
 0x1dc   : > { %v1404_v17 = vpack.c.bf16 %v959_v14, %v959_v14 }
 0x1dd   : > { %v1403_v18 = vpack.c.bf16 %v954_v16, %v954_v16 }
 0x1de   : > { %1148 = vst.msk [vmem:[%s1655_s28 + $0x74] sm:$0xf] %vm1118_vm1, %v1404_v17 }
 0x1df   : > { %1147 = vst.msk [vmem:[%s1655_s28 + $0x70] sm:$0xf] %vm1118_vm1, %v1403_v18 }
 0x1e1   : > { %v1489_v19 = vpop.f32.mrb[16].mxu1 }
 0x1e2   : > { %v969_v20 = vadd.f32 %v1489_v19, %v1649_v55  ;;  %v963_v21 = vpop.f32.mrb[17].mxu1 }
 0x1e3   : > { %v964_v22 = vadd.f32 %v1649_v55, %v963_v21 }
 0x1e4   : > { %v1406_v23 = vpack.c.bf16 %v969_v20, %v969_v20 }
 0x1e5   : > { %v1405_v24 = vpack.c.bf16 %v964_v22, %v964_v22 }
 0x1e6   : > { %1150 = vst.msk [vmem:[%s1655_s28 + $0x7c] sm:$0xf] %vm1118_vm1, %v1406_v23 }
 0x1e7   : > { %1149 = vst.msk [vmem:[%s1655_s28 + $0x78] sm:$0xf] %vm1118_vm1, %v1405_v24 }
 0x1e8 PF: > { %s21_s13 = sadd.s32 1, %s1510_s13  }
 0x1e9   : > { %p18_p5 = scmp.ge.s32.totalorder %s21_s13, 4  }
 0x1eb   :  { %20 = sbr.rel (!%p18_p5) target bundleno = 1 (0x1), region = 109 }

</bundles_post_ra>
